<compile_context>
chip_gen: v6e
topology: v6e:2x2x1
jax: 0.10.0
libtpu: 0.0.40
codegen_flags: <defaults>
</compile_context>

<pallas_src>
import functools

import jax
import jax.numpy as jnp
from jax.experimental import pallas as pl
from jax.experimental.pallas import tpu as pltpu


def _hardswish(x):
    # relu6(x + 3) / 6 * x
    return jnp.clip(x + 3.0, 0.0, 6.0) * (1.0 / 6.0) * x


def _round_up(n, m):
    return ((n + m - 1) // m) * m


def densenet_kernel(x_ref, w1_ref, b1_ref, w2t_ref, w2b_ref, b2_ref, o_ref):
    """One (TB, M) batch tile -> (TB, 4M) output tile. No concatenates."""
    x1 = x_ref[...]                                        # (TB, M) f32
    M = x1.shape[1]

    # dense1: Linear(M, M) + HardSwish
    h1 = jnp.dot(x1, w1_ref[...], preferred_element_type=jnp.float32)
    h1 = _hardswish(h1 + b1_ref[...])                      # (TB, M)

    # dense2 on x2 = [x1, h1] without materializing the concat:
    #   x2 @ W2 = x1 @ W2_top + h1 @ W2_bot
    h2 = jnp.dot(x1, w2t_ref[...], preferred_element_type=jnp.float32)
    h2 = h2 + jnp.dot(h1, w2b_ref[...], preferred_element_type=jnp.float32)
    h2 = _hardswish(h2 + b2_ref[...])                      # (TB, 2M)

    # Output x3 = [x1, h1, h2] written as direct slice stores (no lane shuffles).
    o_ref[:, :M] = x1
    o_ref[:, M:2 * M] = h1
    o_ref[:, 2 * M:] = h2


def prepare_params(w1, b1, w2, b2):
    """One-time parameter prep (hoisted out of the forward hot path).

    Takes torch-layout weights: w1 (M, M) = (out, in), w2 (2M, 2M) = (out, in),
    biases b1 (M,), b2 (2M,). Returns kernel-ready arrays.
    """
    M = w1.shape[1]
    w1_t = jnp.asarray(w1, jnp.float32).T                  # (in=M, out=M)
    w2_t = jnp.asarray(w2, jnp.float32).T                  # (in=2M, out=2M)
    return {
        "w1_t": w1_t,                                      # (M, M)
        "b1": jnp.asarray(b1, jnp.float32).reshape(1, M),  # (1, M)
        "w2_top": w2_t[:M, :],                             # (M, 2M)  multiplies x1
        "w2_bot": w2_t[M:, :],                             # (M, 2M)  multiplies h1
        "b2": jnp.asarray(b2, jnp.float32).reshape(1, 2 * M),  # (1, 2M)
    }


@functools.partial(jax.jit, static_argnames=("block_b",))
def densenet_forward(x1, params, *, block_b=512):
    """x1: (B, M) float32. params: output of prepare_params()."""
    x1 = jnp.asarray(x1, jnp.float32)
    B, M = x1.shape

    # Batch tile: multiple of 8 sublanes, capped at block_b (VMEM-friendly).
    TB = min(block_b, _round_up(B, 8))
    B_pad = _round_up(B, TB)
    if B_pad != B:
        x1 = jnp.pad(x1, ((0, B_pad - B), (0, 0)))

    grid = (B_pad // TB,)
    out = pl.pallas_call(
        densenet_kernel,
        out_shape=jax.ShapeDtypeStruct((B_pad, 4 * M), jnp.float32),
        grid=grid,
        in_specs=[
            pl.BlockSpec((TB, M), lambda i: (i, 0)),        # x tile (pipelined)
            pl.BlockSpec((M, M), lambda i: (0, 0)),         # W1   (resident)
            pl.BlockSpec((1, M), lambda i: (0, 0)),         # b1   (resident)
            pl.BlockSpec((M, 2 * M), lambda i: (0, 0)),     # W2_top (resident)
            pl.BlockSpec((M, 2 * M), lambda i: (0, 0)),     # W2_bot (resident)
            pl.BlockSpec((1, 2 * M), lambda i: (0, 0)),     # b2   (resident)
        ],
        out_specs=pl.BlockSpec((TB, 4 * M), lambda i: (i, 0)),
        compiler_params=pltpu.CompilerParams(
            dimension_semantics=("parallel",),
        ),
    )(x1, params["w1_t"], params["b1"],
      params["w2_top"], params["w2_bot"], params["b2"])

    return out[:B] if B_pad != B else out


def orthogonal_init(key, shape, std=1.0):
    """Deterministic orthogonal init (mirrors torch.nn.init.orthogonal_ semantics)."""
    a = jax.random.normal(key, shape, dtype=jnp.float32)
    q, r = jnp.linalg.qr(a)
    q = q * jnp.sign(jnp.diag(r))[None, :]
    return std * q


def densenet_reference(x1, w1, b1, w2, b2):
    h1 = _hardswish(x1 @ w1.T + b1)
    x2 = jnp.concatenate([x1, h1], axis=1)
    h2 = _hardswish(x2 @ w2.T + b2)
    return jnp.concatenate([x2, h2], axis=1)


if __name__ == "__main__":
    key = jax.random.PRNGKey(0)
    k_x, k_w1, k_w2, k_xl = jax.random.split(key, 4)

    B, mid_dim = 2, 32

    # Parameters (torch layout: weight (out, in), bias (out,)), bias_const = 0.0
    w1 = orthogonal_init(k_w1, (mid_dim, mid_dim), std=1.0)
    b1 = jnp.zeros((mid_dim,), jnp.float32)
    w2 = orthogonal_init(k_w2, (2 * mid_dim, 2 * mid_dim), std=1.0)
    b2 = jnp.zeros((2 * mid_dim,), jnp.float32)

    params = prepare_params(w1, b1, w2, b2)   # hoisted: done once

    # Small batch (matches module usage).
    x1 = jax.random.normal(k_x, (B, mid_dim), dtype=jnp.float32)
    out = jax.block_until_ready(densenet_forward(x1, params))
    ref = densenet_reference(x1, w1, b1, w2, b2)
    assert out.shape == (B, 4 * mid_dim), out.shape
    assert jnp.allclose(out, ref, atol=1e-5, rtol=1e-5), "mismatch vs reference (small B)"

    # Larger, non-multiple-of-tile batch exercises the grid + padding path.
    Bl = 300
    xl = jax.random.normal(k_xl, (Bl, mid_dim), dtype=jnp.float32)
    out_l = jax.block_until_ready(densenet_forward(xl, params, block_b=128))
    ref_l = densenet_reference(xl, w1, b1, w2, b2)
    assert out_l.shape == (Bl, 4 * mid_dim), out_l.shape
    assert jnp.allclose(out_l, ref_l, atol=1e-5, rtol=1e-5), "mismatch vs reference (large B)"

    print("KERNEL_OK")
</pallas_src>

<mosaic_0001>
module attributes {stable_mosaic.version = 11 : i64} {
  func.func @densenet_kernel(%arg0: i32, %arg1: memref<8x32xf32, #tpu.memory_space<vmem>>, %arg2: memref<32x32xf32, #tpu.memory_space<vmem>>, %arg3: memref<1x32xf32, #tpu.memory_space<vmem>>, %arg4: memref<32x64xf32, #tpu.memory_space<vmem>>, %arg5: memref<32x64xf32, #tpu.memory_space<vmem>>, %arg6: memref<1x64xf32, #tpu.memory_space<vmem>>, %arg7: memref<8x128xf32, #tpu.memory_space<vmem>>) attributes {dimension_semantics = [#tpu.dimension_semantics<parallel>], iteration_bounds = array<i64: 1>, scalar_prefetch = 0 : i64, scratch_operands = 0 : i64, tpu.core_type = #tpu.core_type<tc>, window_params = [{transform_indices = @transform_0, window_bounds = array<i64: 8, 32>}, {pipeline_mode = #tpu.pipeline_mode<synchronous>, transform_indices = @transform_1, window_bounds = array<i64: 32, 32>}, {pipeline_mode = #tpu.pipeline_mode<synchronous>, transform_indices = @transform_2, window_bounds = array<i64: 1, 32>}, {pipeline_mode = #tpu.pipeline_mode<synchronous>, transform_indices = @transform_3, window_bounds = array<i64: 32, 64>}, {pipeline_mode = #tpu.pipeline_mode<synchronous>, transform_indices = @transform_4, window_bounds = array<i64: 32, 64>}, {pipeline_mode = #tpu.pipeline_mode<synchronous>, transform_indices = @transform_5, window_bounds = array<i64: 1, 64>}, {transform_indices = @transform_6, window_bounds = array<i64: 8, 128>}]} {
    %c0 = arith.constant 0 : index
    %c0_0 = arith.constant 0 : index
    %0 = vector.load %arg1[%c0, %c0_0] : memref<8x32xf32, #tpu.memory_space<vmem>>, vector<8x32xf32>
    %c0_1 = arith.constant 0 : index
    %c0_2 = arith.constant 0 : index
    %1 = vector.load %arg2[%c0_1, %c0_2] : memref<32x32xf32, #tpu.memory_space<vmem>>, vector<32x32xf32>
    %cst = arith.constant dense<0.000000e+00> : vector<8x32xf32>
    %2 = tpu.matmul %0, %1, %cst {dimension_numbers = #tpu.dot_dimension_numbers<[1], [0], [0], [1], [0, 0, 1, 1], [], []>} : vector<8x32xf32>, vector<32x32xf32>, vector<8x32xf32> -> vector<8x32xf32>
    %c0_3 = arith.constant 0 : index
    %c0_4 = arith.constant 0 : index
    %3 = vector.load %arg3[%c0_3, %c0_4] : memref<1x32xf32, #tpu.memory_space<vmem>>, vector<1x32xf32>
    %4 = vector.broadcast %3 : vector<1x32xf32> to vector<8x32xf32>
    %5 = arith.addf %2, %4 : vector<8x32xf32>
    %cst_5 = arith.constant 3.000000e+00 : f32
    %6 = vector.broadcast %cst_5 : f32 to vector<8x32xf32>
    %7 = arith.addf %5, %6 : vector<8x32xf32>
    %cst_6 = arith.constant 0.000000e+00 : f32
    %cst_7 = arith.constant 6.000000e+00 : f32
    %8 = vector.broadcast %cst_6 : f32 to vector<8x32xf32>
    %9 = arith.maximumf %8, %7 : vector<8x32xf32>
    %10 = vector.broadcast %cst_7 : f32 to vector<8x32xf32>
    %11 = arith.minimumf %10, %9 : vector<8x32xf32>
    %cst_8 = arith.constant 0.166666672 : f32
    %12 = vector.broadcast %cst_8 : f32 to vector<8x32xf32>
    %13 = arith.mulf %11, %12 : vector<8x32xf32>
    %14 = arith.mulf %13, %5 : vector<8x32xf32>
    %c0_9 = arith.constant 0 : index
    %c0_10 = arith.constant 0 : index
    %15 = vector.load %arg4[%c0_9, %c0_10] : memref<32x64xf32, #tpu.memory_space<vmem>>, vector<32x64xf32>
    %cst_11 = arith.constant dense<0.000000e+00> : vector<8x64xf32>
    %16 = tpu.matmul %0, %15, %cst_11 {dimension_numbers = #tpu.dot_dimension_numbers<[1], [0], [0], [1], [0, 0, 1, 1], [], []>} : vector<8x32xf32>, vector<32x64xf32>, vector<8x64xf32> -> vector<8x64xf32>
    %c0_12 = arith.constant 0 : index
    %c0_13 = arith.constant 0 : index
    %17 = vector.load %arg5[%c0_12, %c0_13] : memref<32x64xf32, #tpu.memory_space<vmem>>, vector<32x64xf32>
    %cst_14 = arith.constant dense<0.000000e+00> : vector<8x64xf32>
    %18 = tpu.matmul %14, %17, %cst_14 {dimension_numbers = #tpu.dot_dimension_numbers<[1], [0], [0], [1], [0, 0, 1, 1], [], []>} : vector<8x32xf32>, vector<32x64xf32>, vector<8x64xf32> -> vector<8x64xf32>
    %19 = arith.addf %16, %18 : vector<8x64xf32>
    %c0_15 = arith.constant 0 : index
    %c0_16 = arith.constant 0 : index
    %20 = vector.load %arg6[%c0_15, %c0_16] : memref<1x64xf32, #tpu.memory_space<vmem>>, vector<1x64xf32>
    %21 = vector.broadcast %20 : vector<1x64xf32> to vector<8x64xf32>
    %22 = arith.addf %19, %21 : vector<8x64xf32>
    %cst_17 = arith.constant 3.000000e+00 : f32
    %23 = vector.broadcast %cst_17 : f32 to vector<8x64xf32>
    %24 = arith.addf %22, %23 : vector<8x64xf32>
    %cst_18 = arith.constant 0.000000e+00 : f32
    %cst_19 = arith.constant 6.000000e+00 : f32
    %25 = vector.broadcast %cst_18 : f32 to vector<8x64xf32>
    %26 = arith.maximumf %25, %24 : vector<8x64xf32>
    %27 = vector.broadcast %cst_19 : f32 to vector<8x64xf32>
    %28 = arith.minimumf %27, %26 : vector<8x64xf32>
    %cst_20 = arith.constant 0.166666672 : f32
    %29 = vector.broadcast %cst_20 : f32 to vector<8x64xf32>
    %30 = arith.mulf %28, %29 : vector<8x64xf32>
    %31 = arith.mulf %30, %22 : vector<8x64xf32>
    %c0_21 = arith.constant 0 : index
    %c0_22 = arith.constant 0 : index
    %32 = vector.load %arg7[%c0_21, %c0_22] : memref<8x128xf32, #tpu.memory_space<vmem>>, vector<8x32xf32>
    tpu.vector_store %arg7[%c0_21, %c0_22], %0 {strides = array<i32>} : memref<8x128xf32, #tpu.memory_space<vmem>>, vector<8x32xf32>,
    %c0_23 = arith.constant 0 : index
    %c32 = arith.constant 32 : index
    %33 = vector.load %arg7[%c0_23, %c32] : memref<8x128xf32, #tpu.memory_space<vmem>>, vector<8x32xf32>
    tpu.vector_store %arg7[%c0_23, %c32], %14 {strides = array<i32>} : memref<8x128xf32, #tpu.memory_space<vmem>>, vector<8x32xf32>,
    %c0_24 = arith.constant 0 : index
    %c64 = arith.constant 64 : index
    %34 = vector.load %arg7[%c0_24, %c64] : memref<8x128xf32, #tpu.memory_space<vmem>>, vector<8x64xf32>
    tpu.vector_store %arg7[%c0_24, %c64], %31 {strides = array<i32>} : memref<8x128xf32, #tpu.memory_space<vmem>>, vector<8x64xf32>,
    return
  }
  func.func @transform_0(%arg0: i32) -> (i32, i32) {
    %c0_i32 = arith.constant 0 : i32
    %c0_i32_0 = arith.constant 0 : i32
    return %arg0, %c0_i32 : i32, i32
  }
  func.func @transform_1(%arg0: i32) -> (i32, i32) {
    %c0_i32 = arith.constant 0 : i32
    %c0_i32_0 = arith.constant 0 : i32
    %c0_i32_1 = arith.constant 0 : i32
    return %c0_i32, %c0_i32_0 : i32, i32
  }
  func.func @transform_2(%arg0: i32) -> (i32, i32) {
    %c0_i32 = arith.constant 0 : i32
    %c0_i32_0 = arith.constant 0 : i32
    %c0_i32_1 = arith.constant 0 : i32
    return %c0_i32, %c0_i32_0 : i32, i32
  }
  func.func @transform_3(%arg0: i32) -> (i32, i32) {
    %c0_i32 = arith.constant 0 : i32
    %c0_i32_0 = arith.constant 0 : i32
    %c0_i32_1 = arith.constant 0 : i32
    return %c0_i32, %c0_i32_0 : i32, i32
  }
  func.func @transform_4(%arg0: i32) -> (i32, i32) {
    %c0_i32 = arith.constant 0 : i32
    %c0_i32_0 = arith.constant 0 : i32
    %c0_i32_1 = arith.constant 0 : i32
    return %c0_i32, %c0_i32_0 : i32, i32
  }
  func.func @transform_5(%arg0: i32) -> (i32, i32) {
    %c0_i32 = arith.constant 0 : i32
    %c0_i32_0 = arith.constant 0 : i32
    %c0_i32_1 = arith.constant 0 : i32
    return %c0_i32, %c0_i32_0 : i32, i32
  }
  func.func @transform_6(%arg0: i32) -> (i32, i32) {
    %c0_i32 = arith.constant 0 : i32
    %c0_i32_0 = arith.constant 0 : i32
    return %arg0, %c0_i32 : i32, i32
  }
}

</mosaic_0001>

<bundles_post_ra>
// kernel: densenet_forward.1
= control target key start
LH: loop header
LB: loop body
LE: loop exit
PB: predicated region body
PF: predicated region fallthrough
CT: control target
= control target key end

     0   :  { %11 = vsyncpa [#allocation3], 0  ;;  %s541_s0 = inlined_call_operand.vmem [shape: f32[8,32], index: 0, kind: input, shape index: {}]   ;;  %s542_s1 = inlined_call_operand.hbm [shape: f32[32,32], index: 1, kind: input, shape index: {}]   ;;  %s543_s2 = inlined_call_operand.vmem [shape: f32[1,32], index: 2, kind: input, shape index: {}]   ;;  %s544_s3 = inlined_call_operand.hbm [shape: f32[32,64], index: 3, kind: input, shape index: {}]   ;;  %s545_s4 = inlined_call_operand.hbm [shape: f32[32,64], index: 4, kind: input, shape index: {}]   ;;  %s546_s5 = inlined_call_operand.vmem [shape: f32[1,64], index: 5, kind: input, shape index: {}]   ;;  %s547_s6 = inlined_call_operand.vmem [shape: f32[8,128], index: 6, kind: output, shape index: {}]  }
   0x1   :  { %12 = vsyncpa [#allocation5], 0  ;;  %s463_s21 = smov [#allocation4]   ;;  %s464_s23 = smov [#allocation2]  }
   0x2   :  { %s34_s22 = sshll.u32 %s463_s21, 4  ;;  %s20_s24 = sshll.u32 %s464_s23, 4  ;;  %s35_s22 = int_to_ptr.vmem [resolvable:$true] %s34_s22  ;;  %s21_s24 = int_to_ptr.vmem [resolvable:$true] %s20_s24 }
   0x3   :  { %s407_s25 = scalar_lea.vmem %s35_s22, 512  ;;  %p412_p1 = scmp.lt.s32.totalorder %s35_s22, %s35_s22 }
   0x4   :  { %p408_p0 = scmp.ne.s32.totalorder %s35_s22, %s407_s25  ;;  %p413_p2 = scmp.lt.s32.totalorder %s407_s25, %s407_s25 }
   0x6   :  { %p414_p3 = por %p413_p2, %p412_p1 }
   0x8   :  { %p415_p4 = pnand %p414_p3, %p408_p0 }
   0xa   :  { %418 = shalt.err (!%p415_p4)
}
   0xb   :  { %s465_s26 = smov 128   ;;  %s466_s27 = smov 8  }
   0xc   :  { %40 = dma.hbm_to_vmem [thread:$0]  %s544_s3, 512, %s35_s22, [#allocation5], %s465_s26, %s465_s26, %s466_s27  }
   0xd   :  { %s427_s30 = scalar_lea.vmem %s21_s24, 512  ;;  %p432_p6 = scmp.lt.s32.totalorder %s21_s24, %s21_s24 }
   0xe   :  { %p428_p5 = scmp.ne.s32.totalorder %s21_s24, %s427_s30  ;;  %p433_p7 = scmp.lt.s32.totalorder %s427_s30, %s427_s30 }
  0x10   :  { %p434_p8 = por %p433_p7, %p432_p6 }
  0x12   :  { %p435_p9 = pnand %p434_p8, %p428_p5 }
  0x14   :  { %438 = shalt.err (!%p435_p9)
}
  0x15   :  { %26 = dma.hbm_to_vmem [thread:$0]  %s542_s1, 512, %s21_s24, [#allocation3], %s465_s26, %s465_s26, %s466_s27  }
  0x16   :  { %s467_s9 = smov [#allocation6]  }
  0x17   :  { %s46_s10 = sshll.u32 %s467_s9, 4  ;;  %s47_s10 = int_to_ptr.vmem [resolvable:$true] %s46_s10 }
  0x18   :  { %s447_s11 = scalar_lea.vmem %s47_s10, 512  ;;  %p452_p11 = scmp.lt.s32.totalorder %s47_s10, %s47_s10 }
  0x19   :  { %p448_p10 = scmp.ne.s32.totalorder %s47_s10, %s447_s11  ;;  %p453_p12 = scmp.lt.s32.totalorder %s447_s11, %s447_s11 }
  0x1b   :  { %p454_p13 = por %p453_p12, %p452_p11 }
  0x1d   :  { %p455_p0 = pnand %p454_p13, %p448_p10 }
  0x1f   :  { %458 = shalt.err (!%p455_p0)
}
  0x20   :  { %52 = dma.hbm_to_vmem [thread:$0]  %s545_s4, 512, %s47_s10, [#allocation5], %s465_s26, %s465_s26, %s466_s27  }
  0x21   :  { %459 = dma.done.wait [#allocation3], 512  }
  0x22   :  { %460 = vsyncadd [#allocation3], 4294966784 }
  0x23   :  { %461 = dma.done.wait [#allocation5], 1024  }
  0x24   :  { %462 = vsyncadd [#allocation5], 4294966272  ;;  %v468_v0 = vmov 0.0   ;;  %vm469_vm0 = vmmov 0   ;;  %v68_v1 = vld [vmem:[#allocation2 + $0x18] sm:$0xff]  ;;  %v67_v2 = vld [vmem:[#allocation2 + $0x10] sm:$0xff] }
  0x25   :  { %357 = vmatprep.subr.mxu0 %v468_v0  ;;  %365 = vmatprep.mubr.msk.f32.mxu0 %vm469_vm0, %v468_v0  ;;  %v64_v3 = vld [vmem:[%s541_s0] sm:$0xff]  ;;  %vm76_vm1 = vcmask 261120   ;;  %v66_v4 = vld [vmem:[#allocation2 + $0x8] sm:$0xff]  ;;  %v158_v6 = vld [vmem:[#allocation4 + $0x18] sm:$0xff]  ;;  %s470_s16 = smov 32   ;;  %vm323_vm2 = vcmask 523520  }
  0x26   :  { %368 = vmatprep.subr.mxu1 %v468_v0  ;;  %376 = vmatprep.mubr.msk.f32.mxu1 %vm469_vm0, %v468_v0  ;;  %319 = vst.msk [vmem:[%s547_s6] sm:$0xff] %vm76_vm1, %v64_v3  ;;  %v65_v5 = vld [vmem:[#allocation2] sm:$0xff]  ;;  %v162_v7 = vld [vmem:[#allocation6 + $0x18] sm:$0xff]  ;;  %v157_v8 = vld [vmem:[#allocation4 + $0x10] sm:$0xff]  ;;  %s471_s20 = smov 64   ;;  %vm329_vm3 = vcmask 1048064  }
  0x27   :  { %358 = vmatpush3.msra.mxu0 %v68_v1  ;;  %369 = vmatpush3.msra.mxu1 %v162_v7  ;;  %v161_v9 = vld [vmem:[#allocation6 + $0x10] sm:$0xff]  ;;  %v156_v10 = vld [vmem:[#allocation4 + $0x8] sm:$0xff]  ;;  %v155_v12 = vld [vmem:[#allocation4] sm:$0xff] }
  0x28   :  { %359 = vmatprep.subr.mxu0 %v468_v0  ;;  %370 = vmatprep.subr.mxu1 %v468_v0  ;;  %v160_v11 = vld [vmem:[#allocation6 + $0x8] sm:$0xff]  ;;  %v159_v13 = vld [vmem:[#allocation6] sm:$0xff] }
  0x29   :  { %360 = vmatpush3.msra.mxu0 %v67_v2  ;;  %371 = vmatpush3.msra.mxu1 %v161_v9  ;;  %v337_v14 = vld [vmem:[%s543_s2] ss:$0 sm:$0xff] }
  0x2a   :  { %361 = vmatprep.subr.mxu0 %v468_v0  ;;  %372 = vmatprep.subr.mxu1 %v468_v0  ;;  %v341_v27 = vld [vmem:[%s546_s5] ss:$0 sm:$0xff] }
  0x2b   :  { %362 = vmatpush3.msra.mxu0 %v66_v4  ;;  %373 = vmatpush3.msra.mxu1 %v160_v11 }
  0x2c   :  { %363 = vmatprep.subr.mxu0 %v468_v0  ;;  %374 = vmatprep.subr.mxu1 %v468_v0 }
  0x2d   :  { %364 = vmatpush3.msra.mxu0 %v65_v5  ;;  %375 = vmatpush3.msra.mxu1 %v159_v13 }
  0x2e   :  { %366 = vmatmul.mubr.msk.f32.vlgmr.msra.gmra.mxu0 %vm76_vm1, %v64_v3  ;;  %379 = vmatprep.subr.mxu0 %v468_v0 }
  0x2f   :  { %387 = vmatprep.mubr.msk.f32.mxu0 %vm469_vm0, %v468_v0  ;;  %380 = vmatpush3.msra.mxu0 %v158_v6 }
  0x30   :  { %381 = vmatprep.subr.mxu0 %v468_v0 }
  0x31   :  { %382 = vmatpush3.msra.mxu0 %v157_v8 }
  0x32   :  { %383 = vmatprep.subr.mxu0 %v468_v0 }
  0x33   :  { %384 = vmatpush3.msra.mxu0 %v156_v10 }
  0x34   :  { %385 = vmatprep.subr.mxu0 %v468_v0 }
  0x35   :  { %386 = vmatpush3.msra.mxu0 %v155_v12 }
  0x36   :  { %388 = vmatmul.mubr.msk.f32.vlgmr.msra.gmra.mxu0 %vm76_vm1, %v64_v3 }
  0xee   :  { %v146_v15 = vpop.f32.mrf.mxu0 }
  0xef   :  { %v147_v16 = vadd.f32 %v337_v14, %v146_v15 }
  0xf0   :  { %v367_v17 = vpop.f32.mrf.mxu0 }
  0xf1   :  { %v150_v18 = vadd.f32 3.0, %v147_v16 }
  0xf3   :  { %v151_v19 = vmax.f32 %v150_v18, 0.0 }
  0xf5   :  { %v152_v20 = vmin.f32 %v151_v19, 6.0 }
  0xf6   :  { %v302_v23 = vpop.f32.mrf.mxu0 }
  0xf7   :  { %v153_v21 = vmul.f32 0.16666667, %v152_v20 }
  0xf8   :  { %v389_v24 = vpop.f32.mrf.mxu0 }
  0xf9   :  { %v154_v22 = vmul.f32 %v153_v21, %v147_v16 }
  0xfb   :  { %320 = vrot.lane.b32.xlu0 %v154_v22, %s470_s16  ;;  %377 = vmatmul.mubr.msk.f32.vlgmr.msra.gmra.mxu1 %vm76_vm1, %v154_v22 }
 0x16d   :  { %v321_v25 = vpop.permute.xlu0 %320 }
 0x16e   :  { %324 = vst.msk [vmem:[%s547_s6] sm:$0xff] %vm323_vm2, %v321_v25 }
 0x1bb   :  { %v232_v26 = vpop.f32.mrf.mxu1 }
 0x1bc   :  { %v303_v28 = vadd.f32 %v302_v23, %v232_v26 }
 0x1bd   :  { %v378_v29 = vpop.f32.mrf.mxu1 }
 0x1be   :  { %v313_v30 = vadd.f32 %v341_v27, %v303_v28 }
 0x1c0   :  { %v314_v31 = vadd.f32 3.0, %v313_v30 }
 0x1c2   :  { %v315_v32 = vmax.f32 %v314_v31, 0.0 }
 0x1c4   :  { %v316_v33 = vmin.f32 %v315_v32, 6.0 }
 0x1c6   :  { %v317_v34 = vmul.f32 0.16666667, %v316_v33 }
 0x1c8   :  { %v318_v35 = vmul.f32 %v317_v34, %v313_v30 }
 0x1ca   :  { %326 = vrot.lane.b32.xlu0 %v318_v35, %s471_s20 }
 0x23c   :  { %v327_v36 = vpop.permute.xlu0 %326 }
 0x23d   :  { %330 = vst.msk [vmem:[%s547_s6] sm:$0xff] %vm329_vm3, %v327_v36 }
 0x23e   :  { %335 = vsyncpa [#allocation3], 1 }
 0x23f   :  { %336 = vsyncpa [#allocation5], 1 }

</bundles_post_ra>
